<compile_context>
chip_gen: v7x
topology: tpu7x:2x2x1
jax: 0.10.0
libtpu: 0.0.40
codegen_flags: <defaults>
</compile_context>

<pallas_src>
import math
import functools

import jax
import jax.numpy as jnp
from jax.experimental import pallas as pl
from jax.experimental.pallas import tpu as pltpu


def _arcface_kernel(labels_ref, logits_ref, out_ref, *, scale, cos_m, sin_m,
                    theta, sinmm, tile_c):
    labels = labels_ref[...]                       # (tile_n, 1) int32
    x = logits_ref[...]                            # (tile_n, tile_c) float32

    # Global column index of every lane in this C-tile.
    col0 = pl.program_id(1) * tile_c
    col = col0 + jax.lax.broadcasted_iota(jnp.int32, x.shape, 1)
    # One-hot hit mask; col >= 0 always, so label == -1 (ignore) never hits.
    hit = col == labels                            # broadcast (tile_n,1)->(tile_n,tile_c)

    # Per-row target logit via masked lane reduction (XLU), then do the
    # sqrt / margin math on the (tile_n, 1) column only.  Rows whose label is
    # not inside this C-tile yield t = 0, but they also have no hit, so the
    # margin value is never written for them.
    t = jnp.sum(jnp.where(hit, x, 0.0), axis=-1, keepdims=True)   # (tile_n, 1)
    # TODO(synk): torch does not clamp t*t, so |t| >= 1 on a hit gives NaN;
    #             we keep identical semantics here.
    sin_theta = jnp.sqrt(1.0 - t * t)
    cos_theta_m = t * cos_m - sin_theta * sin_m
    final = jnp.where(t > theta, cos_theta_m, t - sinmm)          # (tile_n, 1)

    out_ref[...] = jnp.where(hit, final, x) * scale


def _round_up(x, m):
    return (x + m - 1) // m * m


def arcface_forward(logits, labels, *, s=64.0, margin=0.5,
                    max_block_bytes=2 * 1024 * 1024):
    """ArcFace forward.

    logits: (N, C) float32 cosine logits; labels: (N,) int (-1 = ignore).
    Returns s * logits with the additive angular margin applied at
    (i, labels[i]) for rows with labels[i] != -1.
    """
    N, C = logits.shape

    # --- tile selection ------------------------------------------------------
    # Lane-dense column tiles (multiple of 128, up to 2048 lanes) and row tiles
    # sized so one f32 block is ~max_block_bytes.  ~2 MiB blocks double-buffered
    # for input + output stay inside v5e's 16 MiB default scoped VMEM and leave
    # plenty of headroom on v6e/v7x while amortizing per-grid-step overhead.
    tile_c = min(_round_up(C, 128), 2048)
    C_pad = _round_up(C, tile_c)
    max_rows = max(8, (max_block_bytes // (4 * tile_c)) // 8 * 8)
    tile_n = min(_round_up(N, 8), max_rows)
    N_pad = _round_up(N, tile_n)

    # --- padding (sliced away at the end) ------------------------------------
    x = logits
    lab = labels.astype(jnp.int32)
    if N_pad != N or C_pad != C:
        x = jnp.pad(x, ((0, N_pad - N), (0, C_pad - C)))
    if N_pad != N:
        lab = jnp.pad(lab, (0, N_pad - N), constant_values=-1)
    labels2d = lab.reshape(N_pad, 1)

    kernel = functools.partial(
        _arcface_kernel,
        scale=s,
        cos_m=math.cos(margin),
        sin_m=math.sin(margin),
        theta=math.cos(math.pi - margin),
        sinmm=math.sin(math.pi - margin) * margin,
        tile_c=tile_c,
    )

    out = pl.pallas_call(
        kernel,
        out_shape=jax.ShapeDtypeStruct((N_pad, C_pad), logits.dtype),
        grid_spec=pltpu.PrefetchScalarGridSpec(
            num_scalar_prefetch=0,
            grid=(N_pad // tile_n, C_pad // tile_c),
            in_specs=[
                pl.BlockSpec((tile_n, 1), lambda i, j: (i, 0)),       # labels
                pl.BlockSpec((tile_n, tile_c), lambda i, j: (i, j)),  # logits
            ],
            out_specs=pl.BlockSpec((tile_n, tile_c), lambda i, j: (i, j)),
        ),
        compiler_params=pltpu.CompilerParams(
            dimension_semantics=("parallel", "parallel")),
        input_output_aliases={1: 0},   # reuse the logits HBM buffer (in-place op)
    )(labels2d, x)

    if N_pad != N or C_pad != C:
        out = out[:N, :C]
    return out


def _reference(logits, labels, *, s=64.0, margin=0.5):
    """Pure-JAX reference mirroring the PyTorch forward."""
    cos_m, sin_m = math.cos(margin), math.sin(margin)
    theta = math.cos(math.pi - margin)
    sinmm = math.sin(math.pi - margin) * margin
    N, C = logits.shape
    one_hot = (jax.lax.broadcasted_iota(jnp.int32, (N, C), 1)
               == labels.reshape(N, 1)) & (labels.reshape(N, 1) != -1)
    t = logits
    sin_theta = jnp.sqrt(1.0 - t * t)
    cos_theta_m = t * cos_m - sin_theta * sin_m
    final = jnp.where(t > theta, cos_theta_m, t - sinmm)
    return jnp.where(one_hot, final, logits) * s


if __name__ == "__main__":
    key = jax.random.PRNGKey(0)
    k_logit, k_label = jax.random.split(key)

    N, C = 8, 128  # small batch of 8 samples, 128 classes
    # Cosine-similarity logits in (-1, 1), as produced by normalized features.
    logits = jax.random.uniform(k_logit, (N, C), jnp.float32,
                                minval=-0.999, maxval=0.999)
    labels = jax.random.randint(k_label, (N,), 0, C, jnp.int32)
    # Mark one sample as "ignore" (label == -1), as the module supports.
    labels = labels.at[3].set(-1)

    ref = _reference(logits, labels)

    out = arcface_forward(logits, labels)
    out = jax.block_until_ready(out)

    assert out.shape == (N, C) and out.dtype == jnp.float32
    assert jnp.allclose(out, ref, atol=1e-5, rtol=1e-5)

    # Also exercise a non-divisible / multi-tile shape to check padding +
    # column-tile offset handling.
    N2, C2 = 37, 3000
    k1, k2 = jax.random.split(jax.random.PRNGKey(1))
    logits2 = jax.random.uniform(k1, (N2, C2), jnp.float32,
                                 minval=-0.999, maxval=0.999)
    labels2 = jax.random.randint(k2, (N2,), -1, C2, jnp.int32)
    out2 = jax.block_until_ready(arcface_forward(logits2, labels2))
    assert jnp.allclose(out2, _reference(logits2, labels2), atol=1e-4, rtol=1e-5)

    print("KERNEL_OK")
</pallas_src>

<mosaic_0001>
module attributes {stable_mosaic.version = 11 : i64} {
  func.func @_arcface_kernel(%arg0: i32, %arg1: i32, %arg2: memref<8x1xi32, #tpu.memory_space<vmem>>, %arg3: memref<8x128xf32, #tpu.memory_space<vmem>>, %arg4: memref<8x128xf32, #tpu.memory_space<vmem>>) attributes {dimension_semantics = [#tpu.dimension_semantics<parallel>, #tpu.dimension_semantics<parallel>], iteration_bounds = array<i64: 1, 1>, scalar_prefetch = 0 : i64, scratch_operands = 0 : i64, tpu.core_type = #tpu.core_type<tc>, window_params = [{transform_indices = @transform_0, window_bounds = array<i64: 8, 1>}, {transform_indices = @transform_1, window_bounds = array<i64: 8, 128>}, {transform_indices = @transform_2, window_bounds = array<i64: 8, 128>}]} {
    %c0 = arith.constant 0 : index
    %c0_0 = arith.constant 0 : index
    %0 = vector.load %arg2[%c0, %c0_0] : memref<8x1xi32, #tpu.memory_space<vmem>>, vector<8x1xi32>
    %c0_1 = arith.constant 0 : index
    %c0_2 = arith.constant 0 : index
    %1 = vector.load %arg3[%c0_1, %c0_2] : memref<8x128xf32, #tpu.memory_space<vmem>>, vector<8x128xf32>
    %c128_i32 = arith.constant 128 : i32
    %2 = arith.muli %arg1, %c128_i32 : i32
    %3 = tpu.iota {dimensions = array<i32: 1>} : vector<8x128xi32>
    %4 = vector.broadcast %2 : i32 to vector<8x128xi32>
    %5 = arith.addi %4, %3 : vector<8x128xi32>
    %6 = vector.broadcast %0 : vector<8x1xi32> to vector<8x128xi32>
    %7 = arith.cmpi eq, %5, %6 : vector<8x128xi32>
    %cst = arith.constant 0.000000e+00 : f32
    %8 = vector.broadcast %cst : f32 to vector<8x128xf32>
    %9 = arith.select %7, %1, %8 : vector<8x128xi1>, vector<8x128xf32>
    %cst_3 = arith.constant dense<0.000000e+00> : vector<8xf32>
    %10 = vector.multi_reduction <add>, %9, %cst_3 [1] : vector<8x128xf32> to vector<8xf32>
    %11 = vector.shape_cast %10 : vector<8xf32> to vector<8x1xf32>
    %12 = arith.mulf %11, %11 : vector<8x1xf32>
    %cst_4 = arith.constant 1.000000e+00 : f32
    %13 = vector.broadcast %cst_4 : f32 to vector<8x1xf32>
    %14 = arith.subf %13, %12 : vector<8x1xf32>
    %15 = math.sqrt %14 : vector<8x1xf32>
    %cst_5 = arith.constant 0.87758255 : f32
    %16 = vector.broadcast %cst_5 : f32 to vector<8x1xf32>
    %17 = arith.mulf %11, %16 : vector<8x1xf32>
    %cst_6 = arith.constant 0.47942555 : f32
    %18 = vector.broadcast %cst_6 : f32 to vector<8x1xf32>
    %19 = arith.mulf %15, %18 : vector<8x1xf32>
    %20 = arith.subf %17, %19 : vector<8x1xf32>
    %cst_7 = arith.constant -0.87758255 : f32
    %21 = vector.broadcast %cst_7 : f32 to vector<8x1xf32>
    %22 = arith.cmpf ogt, %11, %21 : vector<8x1xf32>
    %cst_8 = arith.constant 0.239712775 : f32
    %23 = vector.broadcast %cst_8 : f32 to vector<8x1xf32>
    %24 = arith.subf %11, %23 : vector<8x1xf32>
    %25 = arith.select %22, %20, %24 : vector<8x1xi1>, vector<8x1xf32>
    %26 = vector.shape_cast %25 : vector<8x1xf32> to vector<8x1xf32>
    %27 = vector.broadcast %26 : vector<8x1xf32> to vector<8x128xf32>
    %28 = arith.select %7, %27, %1 : vector<8x128xi1>, vector<8x128xf32>
    %cst_9 = arith.constant 6.400000e+01 : f32
    %29 = vector.broadcast %cst_9 : f32 to vector<8x128xf32>
    %30 = arith.mulf %28, %29 : vector<8x128xf32>
    %c0_10 = arith.constant 0 : index
    %c0_11 = arith.constant 0 : index
    %31 = vector.load %arg4[%c0_10, %c0_11] : memref<8x128xf32, #tpu.memory_space<vmem>>, vector<8x128xf32>
    tpu.vector_store %arg4[%c0_10, %c0_11], %30 {strides = array<i32>} : memref<8x128xf32, #tpu.memory_space<vmem>>, vector<8x128xf32>,
    return
  }
  func.func @transform_0(%arg0: i32, %arg1: i32) -> (i32, i32) {
    %c0_i32 = arith.constant 0 : i32
    %c0_i32_0 = arith.constant 0 : i32
    return %arg0, %c0_i32 : i32, i32
  }
  func.func @transform_1(%arg0: i32, %arg1: i32) -> (i32, i32) {
    %c0_i32 = arith.constant 0 : i32
    return %arg0, %arg1 : i32, i32
  }
  func.func @transform_2(%arg0: i32, %arg1: i32) -> (i32, i32) {
    %c0_i32 = arith.constant 0 : i32
    return %arg0, %arg1 : i32, i32
  }
}

</mosaic_0001>

<bundles_post_ra>
// kernel: tpu_custom_call.1
= control target key start
LH: loop header
LB: loop body
LE: loop exit
PB: predicated region body
PF: predicated region fallthrough
CT: control target
= control target key end

     0   :  { %7 = vsyncpa [#allocation3], 0  ;;  %s173_s0 = inlined_call_operand.vmem [shape: s32[8,1], index: 0, kind: input, shape index: {}]   ;;  %s174_s1 = inlined_call_operand.hbm [shape: f32[8,128], index: 1, kind: input, shape index: {}, may-alias: {1,2}]   ;;  %s175_s2 = inlined_call_operand.hbm [shape: f32[8,128], index: 2, kind: output, shape index: {}, may-alias: {1,2}]  }
   0x1   :  { %8 = vsyncpa [#allocation4], 0  ;;  %s126_s9 = smov [#allocation2]   ;;  %s78_s13 = scalar_lea.hbm %s174_s1, 128 }
   0x2   :  { %s17_s10 = sshll.u32 %s126_s9, 4  ;;  %p79_p0 = scmp.ne.s32.totalorder %s174_s1, %s78_s13  ;;  %s18_s10 = int_to_ptr.vmem [resolvable:$true] %s17_s10 }
   0x3   :  { %p82_p1 = scmp.lt.u32.totalorder %s78_s13, %s174_s1 }
   0x5   :  { %p84_p2 = pnand %p82_p1, %p79_p0 }
   0x7   :  { %87 = shalt.err (!%p84_p2)
}
   0x8   :  { %s88_s18 = scalar_lea.vmem %s18_s10, 128  ;;  %p93_p4 = scmp.lt.s32.totalorder %s18_s10, %s18_s10 }
   0x9   :  { %p89_p3 = scmp.ne.s32.totalorder %s18_s10, %s88_s18  ;;  %p94_p5 = scmp.lt.s32.totalorder %s88_s18, %s88_s18 }
   0xb   :  { %p95_p6 = por %p94_p5, %p93_p4 }
   0xd   :  { %p96_p7 = pnand %p95_p6, %p89_p3 }
   0xf   :  { %99 = shalt.err (!%p96_p7)
}
  0x10   :  { %20 = dma.hbm_to_vmem [thread:$0]  %s174_s1, 128, %s18_s10, [#allocation3]  }
  0x11   :  { %122 = dma.done.wait [#allocation3], 128  }
  0x12   :  { %123 = vsyncadd [#allocation3], 4294967168  ;;  %v127_v0 = vmov 0   ;;  %v24_v1 = vld [vmem:[%s173_s0] sm:$0xff]  ;;  %v27_v2 = vlaneseq  ;;  %s128_s0 = smov [#allocation5]  }
  0x13   :  { %75 = vset.pattern.permute.xlu0 %v127_v0  ;;  %v25_v4 = vld [vmem:[#allocation2] sm:$0xff]  ;;  %s62_s1 = sshll.u32 %s128_s0, 4  ;;  %s63_s1 = int_to_ptr.vmem [resolvable:$true] %s62_s1 }
  0x14   :  { %32 = vperm.xlu0 %75, %v24_v1   ;;  %v28_v3 = vand.u32 127, %v27_v2  ;;  %s100_s23 = scalar_lea.vmem %s63_s1, 128  ;;  %p105_p9 = scmp.lt.s32.totalorder %s63_s1, %s63_s1 }
  0x15   :  { %p101_p8 = scmp.ne.s32.totalorder %s63_s1, %s100_s23  ;;  %p106_p10 = scmp.lt.s32.totalorder %s100_s23, %s100_s23 }
  0x17   :  { %p107_p11 = por %p106_p10, %p105_p9 }
  0x19   :  { %p108_p12 = pnand %p107_p11, %p101_p8 }
  0x93   :  { %v33_v5 = vpop.permute.xlu0 %32 }
  0x94   :  { %vm34_vm0 = vcmp.eq.s32.totalorder %v28_v3, %v33_v5 }
  0x95   :  { %v35_v6 = vsel %vm34_vm0, %v25_v4, 0.0 }
  0x96   :  { %36 = vadd.xlane.f32.xlu0 %v35_v6 }
 0x123   :  { %v37_v7 = vpop.xlane.xlu0 %36 }
 0x124   :  { %v38_v8 = vmul.f32 %v37_v7, %v37_v7  ;;  %v47_v15 = vmul.f32 0.87758255, %v37_v7  ;;  %v71_v18 = vadd.f32 -0.23971277, %v37_v7  ;;  %vm50_vm3 = vcmp.gt.f32.partialorder %v37_v7, -0.87758255 }
 0x126   :  { %v39_v9 = vsub.f32 1.0, %v38_v8 }
 0x128   :  { %76 = vrsqrt.f32 %v39_v9  ;;  %vm42_vm1 = vcmp.eq.f32.partialorder %v39_v9, inf  ;;  %v45_v12 = vand.u32 2147483648, %v39_v9  ;;  %vm44_vm2 = vcmp.eq.f32.partialorder %v39_v9, 0.0 }
 0x132   :  { %v77_v10 = vpop.eup %76 }
 0x133   :  { %v41_v11 = vmul.f32 %v77_v10, %v39_v9 }
 0x135   :  { %v43_v13 = vsel %vm42_vm1, %v39_v9, %v41_v11 }
 0x136   :  { %v46_v14 = vsel %vm44_vm2, %v45_v12, %v43_v13 }
 0x137   :  { %v48_v16 = vmul.f32 0.47942555, %v46_v14 }
 0x139   :  { %v49_v17 = vsub.f32 %v47_v15, %v48_v16 }
 0x13b   :  { %v52_v19 = vsel %vm50_vm3, %v49_v17, %v71_v18 }
 0x13c   :  { %v53_v20 = vsel %vm34_vm0, %v52_v19, %v25_v4 }
 0x13d   :  { %v54_v21 = vmul.f32 64.0, %v53_v20 }
 0x13f   :  { %55 = vst [vmem:[#allocation5] sm:$0xff] %v54_v21 }
 0x140   :  { %111 = shalt.err (!%p108_p12)
}
 0x141   :  { %s112_s26 = scalar_lea.hbm %s175_s2, 128 }
 0x142   :  { %p113_p13 = scmp.ne.s32.totalorder %s175_s2, %s112_s26  ;;  %p116_p0 = scmp.lt.u32.totalorder %s112_s26, %s175_s2 }
 0x144   :  { %p118_p1 = pnand %p116_p0, %p113_p13 }
 0x146   :  { %121 = shalt.err (!%p118_p1)
}
 0x147   :  { %65 = dma.vmem_to_hbm [thread:$0]  %s63_s1, 128, %s175_s2, [#allocation4]  }
 0x148   :  { %124 = dma.done.wait [#allocation4], 128  }
 0x149   :  { %125 = vsyncadd [#allocation4], 4294967168 }
 0x14a   :  { %69 = vsyncpa [#allocation3], 1 }
 0x14b   :  { %70 = vsyncpa [#allocation4], 1 }

</bundles_post_ra>
